<compile_context>
chip_gen: v7x
topology: tpu7x:2x2x1
jax: 0.10.0
libtpu: 0.0.40
codegen_flags: <defaults>
</compile_context>

<pallas_src>
import functools

import jax
import jax.numpy as jnp
import numpy as np
from jax.experimental import pallas as pl
from jax.experimental.pallas import tpu as pltpu


def _round_up(x: int, m: int) -> int:
    return ((x + m - 1) // m) * m


def _sublane_multiple(dtype) -> int:
    # f32 -> 8, bf16 -> 16, int8/fp8 -> 32 rows per sublane-packed vreg group.
    return max(8, 32 // np.dtype(dtype).itemsize)


def _vmem_capacity_bytes() -> int:
    try:
        return int(pltpu.get_tpu_info().vmem_capacity_bytes)
    except Exception:  # pragma: no cover - older runtimes / interpret mode
        return 64 * 1024 * 1024  # conservative: v7x per-TensorCore VMEM


def _decoder_tile_config():
    """Per-generation (tm, tv, vmem_limit_bytes) for the decoder kernel."""
    cap = _vmem_capacity_bytes()
    if cap >= 100 * 1024 * 1024:          # v5e / v6e: 128 MiB physical VMEM
        tm, tv, limit = 512, 4096, 96 * 1024 * 1024
    else:                                 # v7x: 64 MiB per TensorCore
        tm, tv, limit = 512, 2048, 48 * 1024 * 1024
    return tm, tv, min(limit, int(cap * 0.9))


def _dense_vmem_limit():
    cap = _vmem_capacity_bytes()
    limit = 96 * 1024 * 1024 if cap >= 100 * 1024 * 1024 else 48 * 1024 * 1024
    return min(limit, int(cap * 0.9))


# ---------------------------------------------------------------------------
# Kernel 1: fused dense -> gelu -> layernorm, tiled over the row dimension.
# Weights / bias / gamma / beta stay resident across all row tiles.
# ---------------------------------------------------------------------------
def _dense_gelu_ln_kernel(x_ref, w_ref, b_ref, g_ref, beta_ref, o_ref, *, eps):
    # MXU matmul in the operands' native dtype (bf16 fast path), f32 accumulate.
    h = jnp.dot(x_ref[...], w_ref[...], preferred_element_type=jnp.float32)
    h = h + b_ref[...].astype(jnp.float32)

    # exact GELU: 0.5 * h * (1 + erf(h / sqrt(2)))
    inv_sqrt2 = jnp.float32(0.7071067811865476)
    h = 0.5 * h * (1.0 + jax.lax.erf(h * inv_sqrt2))

    # LayerNorm over the full hidden (lane) axis — hidden is never tiled, so
    # the reduction is complete within each block.
    mu = jnp.mean(h, axis=-1, keepdims=True)
    var = jnp.mean((h - mu) * (h - mu), axis=-1, keepdims=True)
    h = (h - mu) * jax.lax.rsqrt(var + jnp.float32(eps))

    o_ref[...] = (
        h * g_ref[...].astype(jnp.float32) + beta_ref[...].astype(jnp.float32)
    ).astype(o_ref.dtype)


def dense_gelu_ln(x, w_dense, b_dense, gamma, beta, *, eps, tile_m=512):
    n, hdim = x.shape
    sub = _sublane_multiple(x.dtype)
    tm = min(tile_m, _round_up(n, sub))
    n_pad = _round_up(n, tm)
    if n_pad != n:
        x = jnp.pad(x, ((0, n_pad - n), (0, 0)))
    grid_m = n_pad // tm

    itm = x.dtype.itemsize
    cost = pl.CostEstimate(
        flops=2 * n_pad * hdim * hdim,
        transcendentals=n_pad * hdim,
        bytes_accessed=(n_pad * hdim * itm                      # x
                        + hdim * hdim * w_dense.dtype.itemsize  # W_dense (once)
                        + n_pad * hdim * itm),                  # out
    )

    kernel = functools.partial(_dense_gelu_ln_kernel, eps=eps)
    out = pl.pallas_call(
        kernel,
        out_shape=jax.ShapeDtypeStruct((n_pad, hdim), x.dtype),
        grid=(grid_m,),
        in_specs=[
            pl.BlockSpec((tm, hdim), lambda i: (i, 0)),     # x row tile
            pl.BlockSpec((hdim, hdim), lambda i: (0, 0)),   # W_dense (resident)
            pl.BlockSpec((1, hdim), lambda i: (0, 0)),      # b_dense
            pl.BlockSpec((1, hdim), lambda i: (0, 0)),      # gamma
            pl.BlockSpec((1, hdim), lambda i: (0, 0)),      # beta
        ],
        out_specs=pl.BlockSpec((tm, hdim), lambda i: (i, 0)),
        compiler_params=pltpu.CompilerParams(
            dimension_semantics=("parallel",),
            vmem_limit_bytes=_dense_vmem_limit(),
        ),
        cost_estimate=cost,
    )(x, w_dense, b_dense, gamma, beta)
    return out[:n] if n_pad != n else out


# ---------------------------------------------------------------------------
# Kernel 2: decoder projection to vocab.
# Grid is (vocab tiles OUTER, row tiles INNER): the W_dec block index only
# depends on the outer axis, so each weight tile is DMA'd once and stays
# VMEM-resident across the entire inner row sweep. Outer axis is "parallel"
# so v7x megacore shards vocab tiles (disjoint output columns per core).
# ---------------------------------------------------------------------------
def _decoder_kernel(h_ref, w_ref, b_ref, o_ref):
    o_ref[...] = (
        jnp.dot(h_ref[...], w_ref[...], preferred_element_type=jnp.float32)
        + b_ref[...].astype(jnp.float32)
    ).astype(o_ref.dtype)


def decoder(h, w_dec, b_dec, *, vocab=None, out_dtype=None):
    n, hdim = h.shape
    v_stored = w_dec.shape[1]
    if vocab is None:
        vocab = v_stored
    if out_dtype is None:
        out_dtype = h.dtype
    out_itm = np.dtype(out_dtype).itemsize

    tile_m, tile_v, vmem_limit = _decoder_tile_config()
    sub = _sublane_multiple(h.dtype)
    tm = min(tile_m, _round_up(n, sub))
    tv = min(tile_v, _round_up(v_stored, 128))
    n_pad = _round_up(n, tm)
    v_pad = _round_up(v_stored, tv)

    if n_pad != n:
        h = jnp.pad(h, ((0, n_pad - n), (0, 0)))
    if v_pad != v_stored:
        # prepare_params() pre-pads weights so this path is normally skipped.
        w_dec = jnp.pad(w_dec, ((0, 0), (0, v_pad - v_stored)))
        b_dec = jnp.pad(b_dec, ((0, 0), (0, v_pad - v_stored)))

    grid_v = v_pad // tv
    grid_m = n_pad // tm

    cost = pl.CostEstimate(
        flops=2 * n_pad * hdim * v_pad,
        transcendentals=0,
        bytes_accessed=(n_pad * hdim * h.dtype.itemsize * grid_v   # h re-read per vocab tile
                        + hdim * v_pad * w_dec.dtype.itemsize      # W_dec streamed once
                        + v_pad * b_dec.dtype.itemsize
                        + n_pad * v_pad * out_itm),
    )

    out = pl.pallas_call(
        _decoder_kernel,
        out_shape=jax.ShapeDtypeStruct((n_pad, v_pad), out_dtype),
        grid=(grid_v, grid_m),                                     # vocab OUTER, rows INNER
        in_specs=[
            pl.BlockSpec((tm, hdim), lambda j, i: (i, 0)),         # h row tile
            pl.BlockSpec((hdim, tv), lambda j, i: (0, j)),         # W_dec tile (resident over i)
            pl.BlockSpec((1, tv), lambda j, i: (0, j)),            # bias tile
        ],
        out_specs=pl.BlockSpec((tm, tv), lambda j, i: (i, j)),
        compiler_params=pltpu.CompilerParams(
            dimension_semantics=("parallel", "arbitrary"),
            vmem_limit_bytes=vmem_limit,
        ),
        cost_estimate=cost,
    )(h, w_dec, b_dec)

    if n_pad != n or v_pad != vocab:
        out = out[:n, :vocab]
    return out


# ---------------------------------------------------------------------------
# Parameter preparation (do once): cast to compute dtype and pre-pad the
# decoder weight/bias to the vocab tile so no per-call jnp.pad copy is needed.
# ---------------------------------------------------------------------------
def prepare_params(params, *, compute_dtype=jnp.bfloat16):
    _, tile_v, _ = _decoder_tile_config()
    vocab = params["w_dec"].shape[1]
    tv = min(tile_v, _round_up(vocab, 128))
    v_pad = _round_up(vocab, tv)

    def cast(a):
        return a.astype(compute_dtype) if compute_dtype is not None else a

    w_dec = cast(params["w_dec"])
    b_dec = cast(params["b_dec"])
    if v_pad != vocab:
        w_dec = jnp.pad(w_dec, ((0, 0), (0, v_pad - vocab)))
        b_dec = jnp.pad(b_dec, ((0, 0), (0, v_pad - vocab)))

    return {
        "w_dense": cast(params["w_dense"]),
        "b_dense": cast(params["b_dense"]),
        "gamma": cast(params["gamma"]),
        "beta": cast(params["beta"]),
        "w_dec": w_dec,
        "b_dec": b_dec,
        "vocab": vocab,
    }


# ---------------------------------------------------------------------------
# Module wrapper
# ---------------------------------------------------------------------------
def roberta_lm_head(features, params, *, eps=1e-5, out_dtype=None):
    """features: (batch, seq, hidden) -> logits (batch, seq, vocab)."""
    b, s, hdim = features.shape
    vocab = params.get("vocab", params["w_dec"].shape[1])

    x = features.reshape(b * s, hdim).astype(params["w_dense"].dtype)
    h = dense_gelu_ln(
        x, params["w_dense"], params["b_dense"],
        params["gamma"], params["beta"], eps=eps,
    )
    y = decoder(h, params["w_dec"], params["b_dec"], vocab=vocab,
                out_dtype=out_dtype)
    return y.reshape(b, s, vocab)


def reference(features, params, *, eps=1e-5):
    x = features.astype(jnp.float32)
    h = x @ params["w_dense"] + params["b_dense"]
    h = 0.5 * h * (1.0 + jax.lax.erf(h / jnp.sqrt(2.0)))
    mu = jnp.mean(h, axis=-1, keepdims=True)
    var = jnp.mean((h - mu) ** 2, axis=-1, keepdims=True)
    h = (h - mu) / jnp.sqrt(var + eps) * params["gamma"] + params["beta"]
    return h @ params["w_dec"] + params["b_dec"]


if __name__ == "__main__":
    # Small shapes; VOCAB deliberately NOT a multiple of 128 to exercise the
    # cdiv + padding path that real RoBERTa (vocab=50265) needs.
    BATCH, SEQ, HIDDEN, VOCAB = 2, 12, 128, 250
    EPS = 1e-5

    key = jax.random.PRNGKey(0)
    k_x, k_wd, k_bd, k_wv = jax.random.split(key, 4)

    features = jax.random.normal(k_x, (BATCH, SEQ, HIDDEN), dtype=jnp.float32)

    raw_params = {
        # dense: Linear(H, H) — stored as (in, out)
        "w_dense": jax.random.normal(k_wd, (HIDDEN, HIDDEN), jnp.float32) * 0.02,
        "b_dense": jax.random.normal(k_bd, (1, HIDDEN), jnp.float32) * 0.02,
        # LayerNorm defaults: weight=1, bias=0
        "gamma": jnp.ones((1, HIDDEN), jnp.float32),
        "beta": jnp.zeros((1, HIDDEN), jnp.float32),
        # decoder: Linear(H, V) — stored as (in, out); tied bias starts at zeros
        "w_dec": jax.random.normal(k_wv, (HIDDEN, VOCAB), jnp.float32) * 0.02,
        "b_dec": jnp.zeros((1, VOCAB), jnp.float32),
    }

    ref = jax.block_until_ready(reference(features, raw_params, eps=EPS))

    # --- exact f32 path: tight numerical check against the reference ---------
    params_f32 = prepare_params(raw_params, compute_dtype=jnp.float32)
    out_f32 = roberta_lm_head(features, params_f32, eps=EPS,
                              out_dtype=jnp.float32)
    out_f32 = jax.block_until_ready(out_f32)
    assert out_f32.shape == (BATCH, SEQ, VOCAB)
    np.testing.assert_allclose(np.asarray(out_f32), np.asarray(ref),
                               rtol=1e-5, atol=1e-5)

    # --- bf16 fast path (recommended production config): loose tolerance -----
    params_bf16 = prepare_params(raw_params, compute_dtype=jnp.bfloat16)
    out_bf16 = roberta_lm_head(features.astype(jnp.bfloat16), params_bf16,
                               eps=EPS)  # emits bf16 logits by default
    out_bf16 = jax.block_until_ready(out_bf16)
    assert out_bf16.shape == (BATCH, SEQ, VOCAB)
    assert out_bf16.dtype == jnp.bfloat16
    np.testing.assert_allclose(np.asarray(out_bf16, dtype=np.float32),
                               np.asarray(ref), rtol=1e-1, atol=5e-2)

    print("KERNEL_OK")
</pallas_src>

<mosaic_0001>
module attributes {stable_mosaic.version = 11 : i64} {
  func.func @_dense_gelu_ln_kernel(%arg0: i32, %arg1: memref<24x128xf32, #tpu.memory_space<vmem>>, %arg2: memref<128x128xf32, #tpu.memory_space<vmem>>, %arg3: memref<1x128xf32, #tpu.memory_space<vmem>>, %arg4: memref<1x128xf32, #tpu.memory_space<vmem>>, %arg5: memref<1x128xf32, #tpu.memory_space<vmem>>, %arg6: memref<24x128xf32, #tpu.memory_space<vmem>>) attributes {dimension_semantics = [#tpu.dimension_semantics<parallel>], iteration_bounds = array<i64: 1>, scalar_prefetch = 0 : i64, scratch_operands = 0 : i64, tpu.core_type = #tpu.core_type<tc>, window_params = [{transform_indices = @transform_0, window_bounds = array<i64: 24, 128>}, {pipeline_mode = #tpu.pipeline_mode<synchronous>, transform_indices = @transform_1, window_bounds = array<i64: 128, 128>}, {pipeline_mode = #tpu.pipeline_mode<synchronous>, transform_indices = @transform_2, window_bounds = array<i64: 1, 128>}, {pipeline_mode = #tpu.pipeline_mode<synchronous>, transform_indices = @transform_3, window_bounds = array<i64: 1, 128>}, {pipeline_mode = #tpu.pipeline_mode<synchronous>, transform_indices = @transform_4, window_bounds = array<i64: 1, 128>}, {transform_indices = @transform_5, window_bounds = array<i64: 24, 128>}]} {
    %c0 = arith.constant 0 : index
    %c0_0 = arith.constant 0 : index
    %0 = vector.load %arg1[%c0, %c0_0] : memref<24x128xf32, #tpu.memory_space<vmem>>, vector<24x128xf32>
    %c0_1 = arith.constant 0 : index
    %c0_2 = arith.constant 0 : index
    %1 = vector.load %arg2[%c0_1, %c0_2] : memref<128x128xf32, #tpu.memory_space<vmem>>, vector<128x128xf32>
    %cst = arith.constant dense<0.000000e+00> : vector<24x128xf32>
    %2 = tpu.matmul %0, %1, %cst {dimension_numbers = #tpu.dot_dimension_numbers<[1], [0], [0], [1], [0, 0, 1, 1], [], []>} : vector<24x128xf32>, vector<128x128xf32>, vector<24x128xf32> -> vector<24x128xf32>
    %c0_3 = arith.constant 0 : index
    %c0_4 = arith.constant 0 : index
    %3 = vector.load %arg3[%c0_3, %c0_4] : memref<1x128xf32, #tpu.memory_space<vmem>>, vector<1x128xf32>
    %4 = vector.broadcast %3 : vector<1x128xf32> to vector<24x128xf32>
    %5 = arith.addf %2, %4 : vector<24x128xf32>
    %cst_5 = arith.constant 5.000000e-01 : f32
    %6 = vector.broadcast %cst_5 : f32 to vector<24x128xf32>
    %7 = arith.mulf %6, %5 : vector<24x128xf32>
    %cst_6 = arith.constant 0.707106769 : f32
    %8 = vector.broadcast %cst_6 : f32 to vector<24x128xf32>
    %9 = arith.mulf %5, %8 : vector<24x128xf32>
    %10 = math.erf %9 : vector<24x128xf32>
    %cst_7 = arith.constant 1.000000e+00 : f32
    %11 = vector.broadcast %cst_7 : f32 to vector<24x128xf32>
    %12 = arith.addf %11, %10 : vector<24x128xf32>
    %13 = arith.mulf %7, %12 : vector<24x128xf32>
    %cst_8 = arith.constant dense<0.000000e+00> : vector<24xf32>
    %14 = vector.multi_reduction <add>, %13, %cst_8 [1] : vector<24x128xf32> to vector<24xf32>
    %15 = vector.shape_cast %14 : vector<24xf32> to vector<24x1xf32>
    %cst_9 = arith.constant 1.280000e+02 : f32
    %16 = vector.broadcast %cst_9 : f32 to vector<24x1xf32>
    %17 = arith.divf %15, %16 : vector<24x1xf32>
    %18 = vector.broadcast %17 : vector<24x1xf32> to vector<24x128xf32>
    %19 = arith.subf %13, %18 : vector<24x128xf32>
    %20 = vector.broadcast %17 : vector<24x1xf32> to vector<24x128xf32>
    %21 = arith.subf %13, %20 : vector<24x128xf32>
    %22 = arith.mulf %19, %21 : vector<24x128xf32>
    %cst_10 = arith.constant dense<0.000000e+00> : vector<24xf32>
    %23 = vector.multi_reduction <add>, %22, %cst_10 [1] : vector<24x128xf32> to vector<24xf32>
    %24 = vector.shape_cast %23 : vector<24xf32> to vector<24x1xf32>
    %cst_11 = arith.constant 1.280000e+02 : f32
    %25 = vector.broadcast %cst_11 : f32 to vector<24x1xf32>
    %26 = arith.divf %24, %25 : vector<24x1xf32>
    %27 = vector.broadcast %17 : vector<24x1xf32> to vector<24x128xf32>
    %28 = arith.subf %13, %27 : vector<24x128xf32>
    %cst_12 = arith.constant 9.99999974E-6 : f32
    %29 = vector.broadcast %cst_12 : f32 to vector<24x1xf32>
    %30 = arith.addf %26, %29 : vector<24x1xf32>
    %31 = math.rsqrt %30 : vector<24x1xf32>
    %32 = vector.broadcast %31 : vector<24x1xf32> to vector<24x128xf32>
    %33 = arith.mulf %28, %32 : vector<24x128xf32>
    %c0_13 = arith.constant 0 : index
    %c0_14 = arith.constant 0 : index
    %34 = vector.load %arg4[%c0_13, %c0_14] : memref<1x128xf32, #tpu.memory_space<vmem>>, vector<1x128xf32>
    %35 = vector.broadcast %34 : vector<1x128xf32> to vector<24x128xf32>
    %36 = arith.mulf %33, %35 : vector<24x128xf32>
    %c0_15 = arith.constant 0 : index
    %c0_16 = arith.constant 0 : index
    %37 = vector.load %arg5[%c0_15, %c0_16] : memref<1x128xf32, #tpu.memory_space<vmem>>, vector<1x128xf32>
    %38 = vector.broadcast %37 : vector<1x128xf32> to vector<24x128xf32>
    %39 = arith.addf %36, %38 : vector<24x128xf32>
    %c0_17 = arith.constant 0 : index
    %c0_18 = arith.constant 0 : index
    %40 = vector.load %arg6[%c0_17, %c0_18] : memref<24x128xf32, #tpu.memory_space<vmem>>, vector<24x128xf32>
    tpu.vector_store %arg6[%c0_17, %c0_18], %39 {strides = array<i32>} : memref<24x128xf32, #tpu.memory_space<vmem>>, vector<24x128xf32>,
    return
  }
  func.func @transform_0(%arg0: i32) -> (i32, i32) {
    %c0_i32 = arith.constant 0 : i32
    %c0_i32_0 = arith.constant 0 : i32
    return %arg0, %c0_i32 : i32, i32
  }
  func.func @transform_1(%arg0: i32) -> (i32, i32) {
    %c0_i32 = arith.constant 0 : i32
    %c0_i32_0 = arith.constant 0 : i32
    %c0_i32_1 = arith.constant 0 : i32
    return %c0_i32, %c0_i32_0 : i32, i32
  }
  func.func @transform_2(%arg0: i32) -> (i32, i32) {
    %c0_i32 = arith.constant 0 : i32
    %c0_i32_0 = arith.constant 0 : i32
    %c0_i32_1 = arith.constant 0 : i32
    return %c0_i32, %c0_i32_0 : i32, i32
  }
  func.func @transform_3(%arg0: i32) -> (i32, i32) {
    %c0_i32 = arith.constant 0 : i32
    %c0_i32_0 = arith.constant 0 : i32
    %c0_i32_1 = arith.constant 0 : i32
    return %c0_i32, %c0_i32_0 : i32, i32
  }
  func.func @transform_4(%arg0: i32) -> (i32, i32) {
    %c0_i32 = arith.constant 0 : i32
    %c0_i32_0 = arith.constant 0 : i32
    %c0_i32_1 = arith.constant 0 : i32
    return %c0_i32, %c0_i32_0 : i32, i32
  }
  func.func @transform_5(%arg0: i32) -> (i32, i32) {
    %c0_i32 = arith.constant 0 : i32
    %c0_i32_0 = arith.constant 0 : i32
    return %arg0, %c0_i32 : i32, i32
  }
}

</mosaic_0001>

<bundles_post_ra>
// kernel: tpu_custom_call.1
= control target key start
LH: loop header
LB: loop body
LE: loop exit
PB: predicated region body
PF: predicated region fallthrough
CT: control target
= control target key end

     0   :  { %10 = vsyncpa [#allocation3], 0  ;;  %s535_s0 = inlined_call_operand.hbm [shape: f32[24,128], index: 0, kind: input, shape index: {}]   ;;  %s536_s1 = inlined_call_operand.hbm [shape: f32[128,128], index: 1, kind: input, shape index: {}]   ;;  %s537_s2 = inlined_call_operand.vmem [shape: f32[1,128], index: 2, kind: input, shape index: {}]   ;;  %s538_s3 = inlined_call_operand.vmem [shape: f32[1,128], index: 3, kind: input, shape index: {}]   ;;  %s539_s4 = inlined_call_operand.vmem [shape: f32[1,128], index: 4, kind: input, shape index: {}]   ;;  %s540_s5 = inlined_call_operand.hbm [shape: f32[24,128], index: 5, kind: output, shape index: {}]  }
   0x1   :  { %11 = vsyncpa [#allocation6], 0 }
   0x2   :  { %12 = vsyncpa [#allocation4], 0  ;;  %s440_s18 = smov [#allocation2]   ;;  %s368_s22 = scalar_lea.hbm %s535_s0, 384 }
   0x3   :  { %s18_s19 = sshll.u32 %s440_s18, 4  ;;  %p369_p0 = scmp.ne.s32.totalorder %s535_s0, %s368_s22  ;;  %s19_s19 = int_to_ptr.vmem [resolvable:$true] %s18_s19 }
   0x4   :  { %p372_p1 = scmp.lt.u32.totalorder %s368_s22, %s535_s0 }
   0x6   :  { %p374_p2 = pnand %p372_p1, %p369_p0 }
   0x8   :  { %377 = shalt.err (!%p374_p2)
}
   0x9   :  { %s378_s27 = scalar_lea.vmem %s19_s19, 384  ;;  %p383_p4 = scmp.lt.s32.totalorder %s19_s19, %s19_s19 }
   0xa   :  { %p379_p3 = scmp.ne.s32.totalorder %s19_s19, %s378_s27  ;;  %p384_p5 = scmp.lt.s32.totalorder %s378_s27, %s378_s27 }
   0xc   :  { %p385_p6 = por %p384_p5, %p383_p4 }
   0xe   :  { %p386_p7 = pnand %p385_p6, %p379_p3 }
  0x10   :  { %389 = shalt.err (!%p386_p7)
}
  0x11   :  { %s441_s28 = smov 128   ;;  %s442_s29 = smov 8  }
  0x12   :  { %24 = dma.hbm_to_vmem [thread:$0]  %s535_s0, 384, %s19_s19, [#allocation3], %s441_s28, %s441_s28, %s442_s29  }
  0x13   :  { %s443_s7 = smov [#allocation5]   ;;  %s390_s11 = scalar_lea.hbm %s536_s1, 2048 }
  0x14   :  { %s30_s8 = sshll.u32 %s443_s7, 4  ;;  %p391_p8 = scmp.ne.s32.totalorder %s536_s1, %s390_s11  ;;  %s31_s8 = int_to_ptr.vmem [resolvable:$true] %s30_s8 }
  0x15   :  { %p394_p9 = scmp.lt.u32.totalorder %s390_s11, %s536_s1 }
  0x17   :  { %p396_p10 = pnand %p394_p9, %p391_p8 }
  0x19   :  { %399 = shalt.err (!%p396_p10)
}
  0x1a   :  { %s400_s16 = scalar_lea.vmem %s31_s8, 2048  ;;  %p405_p12 = scmp.lt.s32.totalorder %s31_s8, %s31_s8 }
  0x1b   :  { %p401_p11 = scmp.ne.s32.totalorder %s31_s8, %s400_s16  ;;  %p406_p13 = scmp.lt.s32.totalorder %s400_s16, %s400_s16 }
  0x1d   :  { %p407_p0 = por %p406_p13, %p405_p12 }
  0x1f   :  { %p408_p1 = pnand %p407_p0, %p401_p11 }
  0x21   :  { %411 = shalt.err (!%p408_p1)
}
  0x22   :  { %36 = dma.hbm_to_vmem [thread:$0]  %s536_s1, 2048, %s31_s8, [#allocation6], %s441_s28, %s441_s28, %s442_s29  }
  0x23   :  { %434 = dma.done.wait [#allocation3], 384  }
  0x24   :  { %435 = vsyncadd [#allocation3], 4294966912 }
  0x25   :  { %436 = dma.done.wait [#allocation6], 2048  }
  0x26   :  { %437 = vsyncadd [#allocation6], 4294965248  ;;  %v444_v0 = vmov 0.0|0.0   ;;  %vm445_vm0 = vmmov 0   ;;  %v446_v1 = vmov 0.0   ;;  %v52_v2 = vld [vmem:[#allocation5] sm:$0xff] }
  0x27   :  { %308 = vmatprep.subr.bf16.mxu0 %v444_v0  ;;  %332 = vmatprep.subr.bf16.mxu1 %v444_v0  ;;  %v53_v3 = vld [vmem:[#allocation5 + $0x8] sm:$0xff]  ;;  %v54_v4 = vld [vmem:[#allocation5 + $0x10] sm:$0xff]  ;;  %v55_v6 = vld [vmem:[#allocation5 + $0x18] sm:$0xff]  ;;  %s447_s22 = smov [#allocation7]  }
  0x28   :  { %299 = vmatprep.mubr.msk.f32.mxu0 %vm445_vm0, %v446_v1  ;;  %302 = vmatprep.mubr.msk.f32.mxu1 %vm445_vm0, %v446_v1  ;;  %v309_v5 = vpack.c.bf16 %v53_v3, %v52_v2  ;;  %v312_v7 = vpack.c.bf16 %v55_v6, %v54_v4  ;;  %v56_v8 = vld [vmem:[#allocation5 + $0x20] sm:$0xff]  ;;  %v57_v9 = vld [vmem:[#allocation5 + $0x28] sm:$0xff]  ;;  %v58_v11 = vld [vmem:[#allocation5 + $0x30] sm:$0xff]  ;;  %s232_s23 = sshll.u32 %s447_s22, 4  ;;  %s233_s23 = int_to_ptr.vmem [resolvable:$true] %s232_s23 }
  0x29   :  { %v315_v10 = vpack.c.bf16 %v57_v9, %v56_v8  ;;  %v59_v12 = vld [vmem:[#allocation5 + $0x38] sm:$0xff]  ;;  %v60_v14 = vld [vmem:[#allocation5 + $0x40] sm:$0xff]  ;;  %v61_v15 = vld [vmem:[#allocation5 + $0x48] sm:$0xff]  ;;  %p417_p3 = scmp.lt.s32.totalorder %s233_s23, %s233_s23 }
  0x2a   :  { %310 = vmatpush3.bf16.msra.mxu0 %v309_v5  ;;  %340 = vmatpush3.bf16.msra.mxu1 %v309_v5  ;;  %v318_v13 = vpack.c.bf16 %v59_v12, %v58_v11  ;;  %v321_v16 = vpack.c.bf16 %v61_v15, %v60_v14  ;;  %v62_v17 = vld [vmem:[#allocation5 + $0x50] sm:$0xff]  ;;  %v63_v18 = vld [vmem:[#allocation5 + $0x58] sm:$0xff]  ;;  %v64_v20 = vld [vmem:[#allocation5 + $0x60] sm:$0xff] }
  0x2b   :  { %311 = vmatprep.subr.bf16.mxu0 %v444_v0  ;;  %333 = vmatprep.subr.bf16.mxu1 %v444_v0  ;;  %v324_v19 = vpack.c.bf16 %v63_v18, %v62_v17  ;;  %v65_v21 = vld [vmem:[#allocation5 + $0x68] sm:$0xff]  ;;  %v66_v23 = vld [vmem:[#allocation5 + $0x70] sm:$0xff]  ;;  %v67_v24 = vld [vmem:[#allocation5 + $0x78] sm:$0xff] }
  0x2c   :  { %v327_v22 = vpack.c.bf16 %v65_v21, %v64_v20  ;;  %v330_v25 = vpack.c.bf16 %v67_v24, %v66_v23  ;;  %v49_v26 = vld [vmem:[#allocation2] sm:$0xff]  ;;  %v50_v27 = vld [vmem:[#allocation2 + $0x8] sm:$0xff]  ;;  %v51_v28 = vld [vmem:[#allocation2 + $0x10] sm:$0xff] }
  0x2d   :  { %v245_v29 = vld [vmem:[%s537_s2] ss:$0 sm:$0xff] }
  0x2e   :  { %313 = vmatpush3.bf16.msra.mxu0 %v312_v7  ;;  %341 = vmatpush3.bf16.msra.mxu1 %v312_v7  ;;  %v246_v12 = vld [vmem:[%s538_s3] ss:$0 sm:$0xff]  ;;  %s412_s3 = scalar_lea.vmem %s233_s23, 384 }
  0x2f   :  { %314 = vmatprep.subr.bf16.mxu0 %v444_v0  ;;  %334 = vmatprep.subr.bf16.mxu1 %v444_v0  ;;  %v247_v14 = vld [vmem:[%s539_s4] ss:$0 sm:$0xff]  ;;  %p413_p2 = scmp.ne.s32.totalorder %s233_s23, %s412_s3  ;;  %p418_p4 = scmp.lt.s32.totalorder %s412_s3, %s412_s3 }
  0x31   :  { %p419_p5 = por %p418_p4, %p417_p3 }
  0x32   :  { %316 = vmatpush3.bf16.msra.mxu0 %v315_v10  ;;  %342 = vmatpush3.bf16.msra.mxu1 %v315_v10 }
  0x33   :  { %317 = vmatprep.subr.bf16.mxu0 %v444_v0  ;;  %335 = vmatprep.subr.bf16.mxu1 %v444_v0  ;;  %p420_p6 = pnand %p419_p5, %p413_p2 }
  0x36   :  { %319 = vmatpush3.bf16.msra.mxu0 %v318_v13  ;;  %343 = vmatpush3.bf16.msra.mxu1 %v318_v13 }
  0x37   :  { %320 = vmatprep.subr.bf16.mxu0 %v444_v0  ;;  %336 = vmatprep.subr.bf16.mxu1 %v444_v0 }
  0x3a   :  { %322 = vmatpush3.bf16.msra.mxu0 %v321_v16  ;;  %344 = vmatpush3.bf16.msra.mxu1 %v321_v16 }
  0x3b   :  { %323 = vmatprep.subr.bf16.mxu0 %v444_v0  ;;  %337 = vmatprep.subr.bf16.mxu1 %v444_v0 }
  0x3e   :  { %325 = vmatpush3.bf16.msra.mxu0 %v324_v19  ;;  %345 = vmatpush3.bf16.msra.mxu1 %v324_v19 }
  0x3f   :  { %326 = vmatprep.subr.bf16.mxu0 %v444_v0  ;;  %338 = vmatprep.subr.bf16.mxu1 %v444_v0 }
  0x42   :  { %328 = vmatpush3.bf16.msra.mxu0 %v327_v22  ;;  %346 = vmatpush3.bf16.msra.mxu1 %v327_v22 }
  0x43   :  { %329 = vmatprep.subr.bf16.mxu0 %v444_v0  ;;  %339 = vmatprep.subr.bf16.mxu1 %v444_v0 }
  0x46   :  { %331 = vmatpush3.bf16.msra.mxu0 %v330_v25  ;;  %347 = vmatpush3.bf16.msra.mxu1 %v330_v25 }
  0x49   :  { %300 = vmatmul.mubr.f32.vlgmr.msra.gmra.mrb[0].mxu0 %v49_v26  ;;  %303 = vmatmul.mubr.f32.vlgmr.msra.gmra.mrb[0].mxu1 %v50_v27 }
  0x4a   :  { %305 = vmatprep.mubr.msk.f32.mxu1 %vm445_vm0, %v446_v1 }
  0x4d   :  { %306 = vmatmul.mubr.f32.gmra.mrb[2].mxu1 %v51_v28 }
 0x11c   :  { %v141_v30 = vpop.f32.mrb[0].mxu0  ;;  %v146_v31 = vpop.f32.mrb[0].mxu1 }
 0x11d   :  { %v142_v32 = vadd.f32 %v245_v29, %v141_v30  ;;  %v147_v33 = vadd.f32 %v245_v29, %v146_v31  ;;  %v301_v34 = vpop.f32.mrb[1].mxu0  ;;  %v304_v35 = vpop.f32.mrb[1].mxu1 }
 0x11f   :  { %v158_v36 = vmul.f32 0.70710677, %v142_v32  ;;  %v159_v37 = vmul.f32 0.70710677, %v147_v33  ;;  %v155_v44 = vmul.f32 0.5, %v142_v32  ;;  %v156_v49 = vmul.f32 0.5, %v147_v33 }
 0x120   :  { %v151_v38 = vpop.f32.mrb[2].mxu1 }
 0x121   :  { %356 = verf.f32 %v158_v36  ;;  %v152_v39 = vadd.f32 %v245_v29, %v151_v38  ;;  %v307_v40 = vpop.f32.mrb[3].mxu1 }
 0x122   :  { %358 = verf.f32 %v159_v37 }
 0x123   :  { %v160_v41 = vmul.f32 0.70710677, %v152_v39  ;;  %v157_v50 = vmul.f32 0.5, %v152_v39 }
 0x125   :  { %360 = verf.f32 %v160_v41 }
 0x12b   :  { %v357_v42 = vpop.eup %356 }
 0x12c   :  { %v359_v43 = vpop.eup %358  ;;  %v164_v45 = vadd.f32 1.0, %v357_v42 }
 0x12d   :  { %v165_v47 = vadd.f32 1.0, %v359_v43 }
 0x12e   :  { %v167_v46 = vmul.f32 %v164_v45, %v155_v44 }
 0x12f   :  { %v361_v48 = vpop.eup %360  ;;  %v168_v53 = vmul.f32 %v165_v47, %v156_v49 }
 0x130   :  { %170 = vadd.xlane.f32.xlu0 %v167_v46  ;;  %v166_v51 = vadd.f32 1.0, %v361_v48 }
 0x132   :  { %v169_v52 = vmul.f32 %v166_v51, %v157_v50 }
 0x134   :  { %174 = vadd.xlane.f32.xlu1 %v169_v52  ;;  %172 = vadd.xlane.f32.xlu0 %v168_v53 }
 0x1bd   :  { %v171_v54 = vpop.xlane.xlu0 %170 }
 0x1be   :  { %v177_v55 = vmul.f32 0.0078125, %v171_v54 }
 0x1c0   :  { %v180_v56 = vsub.f32 %v167_v46, %v177_v55 }
 0x1c1   :  { %v175_v57 = vpop.xlane.xlu1 %174  ;;  %v173_v58 = vpop.xlane.xlu0 %172 }
 0x1c2   :  { %v179_v59 = vmul.f32 0.0078125, %v175_v57  ;;  %v178_v60 = vmul.f32 0.0078125, %v173_v58  ;;  %v183_v61 = vmul.f32 %v180_v56, %v180_v56 }
 0x1c4   :  { %v182_v62 = vsub.f32 %v169_v52, %v179_v59  ;;  %v181_v63 = vsub.f32 %v168_v53, %v178_v60  ;;  %186 = vadd.xlane.f32.xlu1 %v183_v61 }
 0x1c6   :  { %v185_v0 = vmul.f32 %v182_v62, %v182_v62  ;;  %v184_v1 = vmul.f32 %v181_v63, %v181_v63 }
 0x1c8   :  { %190 = vadd.xlane.f32.xlu1 %v185_v0  ;;  %188 = vadd.xlane.f32.xlu0 %v184_v1 }
 0x251   :  { %v187_v2 = vpop.xlane.xlu1 %186 }
 0x252   :  { %v192_v3 = vmul.f32 0.0078125, %v187_v2 }
 0x254   :  { %v195_v4 = vadd.f32 1e-05, %v192_v3 }
 0x255   :  { %v191_v5 = vpop.xlane.xlu1 %190  ;;  %v189_v6 = vpop.xlane.xlu0 %188 }
 0x256   :  { %362 = vrsqrt.f32 %v195_v4  ;;  %v194_v7 = vmul.f32 0.0078125, %v191_v5  ;;  %v193_v8 = vmul.f32 0.0078125, %v189_v6 }
 0x258   :  { %v197_v9 = vadd.f32 1e-05, %v194_v7  ;;  %v196_v10 = vadd.f32 1e-05, %v193_v8 }
 0x25a   :  { %364 = vrsqrt.f32 %v197_v9 }
 0x25b   :  { %366 = vrsqrt.f32 %v196_v10 }
 0x260   :  { %v363_v11 = vpop.eup %362 }
 0x261   :  { %v201_v13 = vmul.f32 %v363_v11, %v180_v56 }
 0x263   :  { %v211_v15 = vmul.f32 %v246_v12, %v201_v13 }
 0x264   :  { %v365_v16 = vpop.eup %364 }
 0x265   :  { %v367_v17 = vpop.eup %366  ;;  %v203_v18 = vmul.f32 %v365_v16, %v182_v62  ;;  %v221_v19 = vadd.f32 %v247_v14, %v211_v15 }
 0x266   :  { %v202_v20 = vmul.f32 %v367_v17, %v181_v63 }
 0x267   :  { %v213_v21 = vmul.f32 %v246_v12, %v203_v18  ;;  %224 = vst [vmem:[#allocation7] sm:$0xff] %v221_v19 }
 0x268   :  { %v212_v22 = vmul.f32 %v246_v12, %v202_v20 }
 0x269   :  { %v223_v23 = vadd.f32 %v247_v14, %v213_v21 }
 0x26a   :  { %v222_v24 = vadd.f32 %v247_v14, %v212_v22 }
 0x26b   :  { %226 = vst [vmem:[#allocation7 + $0x10] sm:$0xff] %v223_v23 }
 0x26c   :  { %225 = vst [vmem:[#allocation7 + $0x8] sm:$0xff] %v222_v24 }
 0x26d   :  { %423 = shalt.err (!%p420_p6)
}
 0x26e   :  { %s424_s25 = scalar_lea.hbm %s540_s5, 384 }
 0x26f   :  { %p425_p7 = scmp.ne.s32.totalorder %s540_s5, %s424_s25  ;;  %p428_p8 = scmp.lt.u32.totalorder %s424_s25, %s540_s5 }
 0x271   :  { %p430_p9 = pnand %p428_p8, %p425_p7 }
 0x273   :  { %433 = shalt.err (!%p430_p9)
}
 0x274   :  { %238 = dma.vmem_to_hbm [thread:$0]  %s233_s23, 384, %s540_s5, [#allocation4], %s441_s28, %s441_s28, %s442_s29  }
 0x275   :  { %438 = dma.done.wait [#allocation4], 384  }
 0x276   :  { %439 = vsyncadd [#allocation4], 4294966912 }
 0x277   :  { %242 = vsyncpa [#allocation3], 1 }
 0x278   :  { %243 = vsyncpa [#allocation6], 1 }
 0x279   :  { %244 = vsyncpa [#allocation4], 1 }

</bundles_post_ra>
